<compile_context>
chip_gen: v6e
topology: v6e:2x2x1
jax: 0.10.0
libtpu: 0.0.40
codegen_flags: <defaults>
</compile_context>

<pallas_src>
import jax
import jax.numpy as jnp
from jax.experimental import pallas as pl
from jax.experimental.pallas import tpu as pltpu


def _round_up(v, m):
    return ((v + m - 1) // m) * m


_VMEM_TILE_BUDGET = 40 * 1024 * 1024   # conservative: fits v5e/v6e (128 MiB) and v7x (64 MiB)


# ----------------------------------------------------------------------------
# Pallas kernel: per (batch, HW tile) compute out(OC, T_HW) = W(OC, T_K) @ x(T_K, T_HW)
# on the MXU in bf16 with f32 accumulation directly into the output block.
# ----------------------------------------------------------------------------
def _make_kernel(single_k_block):
    if single_k_block:
        # Whole reduction axis in one block: weight stays VMEM-resident for the
        # entire grid (constant block index); one dot per output block.
        def kernel(x_ref, w_ref, o_ref):
            # x_ref: (1, K, T_HW) bf16 | w_ref: (OC, K) bf16 | o_ref: (1, OC, T_HW) f32
            o_ref[0] = jnp.dot(w_ref[...], x_ref[0],
                               preferred_element_type=jnp.float32)
    else:
        # Huge-K fallback: reduction grid axis last; accumulate into the VMEM-resident
        # output block (no scratch accumulator, no epilogue copy).
        def kernel(x_ref, w_ref, o_ref):
            @pl.when(pl.program_id(2) == 0)
            def _():
                o_ref[...] = jnp.zeros_like(o_ref)
            o_ref[0] += jnp.dot(w_ref[...], x_ref[0],
                                preferred_element_type=jnp.float32)
    return kernel


# ----------------------------------------------------------------------------
# Tile selection under an explicit VMEM budget.
# ----------------------------------------------------------------------------
def _select_tiles(HW, K, OC, budget, min_hw_tiles=1):
    """Return (HWp, T_HW, Kp, T_K); prefers no padding + fully resident K."""
    def vmem_bytes(t_hw, t_k):
        # double-buffered bf16 activations + bf16 weights + f32 output blocks
        return 2 * (t_hw * t_k * 2) + 2 * (t_k * OC * 2) + 2 * (OC * t_hw * 4)

    max_hw = 0
    for t in range(128, 2048 + 1, 128):
        if vmem_bytes(t, K) <= budget:
            max_hw = t

    if max_hw:
        if HW <= max_hw and (min_hw_tiles <= 1 or HW <= 128):
            return HW, HW, K, K                        # single full block, no padding
        cap = max_hw
        if min_hw_tiles > 1:
            cap = min(cap, max(128, (HW // min_hw_tiles) // 128 * 128))
        best = 0
        for t in range(128, cap + 1, 128):
            if HW % t == 0:
                best = t
        if best:
            return HW, best, K, K                      # divisor tile, no padding
        if HW <= max_hw:
            return HW, HW, K, K                        # cannot split cleanly; 1 block
        t_hw = min(512, max_hw)
        return _round_up(HW, t_hw), t_hw, K, K         # rare: pad HW only

    # Fallback for enormous K*OC: tile the reduction axis as well.
    t_hw = HW if HW <= 128 else 128
    t_k = 128
    for t in range(128, 2048 + 1, 128):
        if vmem_bytes(t_hw, t) <= budget:
            t_k = t
    hwp = HW if HW <= 128 else _round_up(HW, t_hw)
    return hwp, t_hw, _round_up(K, t_k), t_k


# ----------------------------------------------------------------------------
# Plain-JAX glue: sampling positions, bilinear weights, corner gathers and the
# 4-corner weighted combine (mirrors the PyTorch module line by line).
# Emits x_off as (B, C_in*N, H*W) in `out_dtype` (bf16 for the kernel path, so
# the cast fuses with the combine; f32 for the reference).
# ----------------------------------------------------------------------------
def _bilinear_x_offset(x, offset, ks, padding, out_dtype=jnp.float32):
    b, c, h, w = x.shape
    N = ks * ks
    dtype = offset.dtype

    # reorder offset channels: (x0,y0,x1,y1,...) -> (x0..xN-1, y0..yN-1)
    idx = jnp.concatenate([jnp.arange(0, 2 * N, 2), jnp.arange(1, 2 * N + 1, 2)])
    offset = offset[:, idx]

    # zero padding
    xp = jnp.pad(x, ((0, 0), (0, 0), (padding, padding), (padding, padding)))
    ph, pw = h + 2 * padding, w + 2 * padding

    # p = p_0 + p_n + offset   (rows in first N channels, cols in last N)
    r = (ks - 1) // 2
    pn_x, pn_y = jnp.meshgrid(jnp.arange(-r, r + 1), jnp.arange(-r, r + 1), indexing="ij")
    p_n = jnp.concatenate([pn_x.flatten(), pn_y.flatten()]).reshape(1, 2 * N, 1, 1).astype(dtype)
    p0_x, p0_y = jnp.meshgrid(jnp.arange(1, h + 1), jnp.arange(1, w + 1), indexing="ij")
    p_0 = jnp.concatenate(
        [jnp.tile(p0_x.reshape(1, 1, h, w), (1, N, 1, 1)),
         jnp.tile(p0_y.reshape(1, 1, h, w), (1, N, 1, 1))], axis=1).astype(dtype)
    p = p_0 + p_n + offset                               # (b, 2N, h, w)
    p = jnp.transpose(p, (0, 2, 3, 1))                   # (b, h, w, 2N)

    q_lt = jnp.floor(p)
    q_rb = q_lt + 1.0
    q_lt = jnp.concatenate([jnp.clip(q_lt[..., :N], 0, ph - 1),
                            jnp.clip(q_lt[..., N:], 0, pw - 1)], -1).astype(jnp.int32)
    q_rb = jnp.concatenate([jnp.clip(q_rb[..., :N], 0, ph - 1),
                            jnp.clip(q_rb[..., N:], 0, pw - 1)], -1).astype(jnp.int32)
    q_lb = jnp.concatenate([q_lt[..., :N], q_rb[..., N:]], -1)
    q_rt = jnp.concatenate([q_rb[..., :N], q_lt[..., N:]], -1)

    # out-of-range mask: snap p to floor(p) outside the valid (unpadded) region
    mask = jnp.concatenate(
        [(p[..., :N] < padding) | (p[..., :N] > ph - 1 - padding),
         (p[..., N:] < padding) | (p[..., N:] > pw - 1 - padding)], -1).astype(dtype)
    floor_p = jnp.floor(p)
    p = p * (1.0 - mask) + floor_p * mask
    p = jnp.concatenate([jnp.clip(p[..., :N], 0, ph - 1),
                         jnp.clip(p[..., N:], 0, pw - 1)], -1)

    f = lambda q: q.astype(dtype)
    g_lt = (1 + (f(q_lt)[..., :N] - p[..., :N])) * (1 + (f(q_lt)[..., N:] - p[..., N:]))
    g_rb = (1 - (f(q_rb)[..., :N] - p[..., :N])) * (1 - (f(q_rb)[..., N:] - p[..., N:]))
    g_lb = (1 + (f(q_lb)[..., :N] - p[..., :N])) * (1 - (f(q_lb)[..., N:] - p[..., N:]))
    g_rt = (1 - (f(q_rt)[..., :N] - p[..., :N])) * (1 + (f(q_rt)[..., N:] - p[..., N:]))

    # TODO(synk): the per-pixel data-dependent corner gather stays in XLA; moving it
    # in-kernel (x plane resident in VMEM + in-VMEM / manual-DMA gather) is the next
    # structural step and would eliminate the (B, K, HW) intermediate entirely.
    x_flat = xp.reshape(b, c, ph * pw)

    def get_x_q(q):
        index = (q[..., :N] * pw + q[..., N:]).reshape(b, -1)          # (b, h*w*N)
        gathered = jax.vmap(lambda xf, ix: xf[:, ix])(x_flat, index)   # (b, c, h*w*N)
        return gathered.reshape(b, c, h, w, N)

    # 4-corner bilinear combine, accumulated corner-by-corner (no (b,4,...) stack).
    x_off = g_lt[:, None] * get_x_q(q_lt)
    x_off = x_off + g_rb[:, None] * get_x_q(q_rb)
    x_off = x_off + g_lb[:, None] * get_x_q(q_lb)
    x_off = x_off + g_rt[:, None] * get_x_q(q_rt)         # (b, c, h, w, N)

    # (b, K=C*N, HW): reduction index k = c*N + n on the sublane side (matches
    # weight.reshape(outc, C*N)), HW on the lane side (lane-dense kernel output).
    x_off = jnp.transpose(x_off, (0, 1, 4, 2, 3)).reshape(b, c * N, h * w)
    return x_off.astype(out_dtype)


# ----------------------------------------------------------------------------
# Wrapper: pack operands and launch the Pallas matmul.
# ----------------------------------------------------------------------------
def deform_conv2d(x, offset, weight, ks=3, padding=1):
    b, c, h, w = x.shape
    N = ks * ks
    outc = weight.shape[0]
    out_dtype = x.dtype
    HW, K = h * w, c * N

    # bf16 activations built directly in the fused sampling epilogue (no extra pass);
    # weight is tiny -> cheap bf16 cast.
    x_off = _bilinear_x_offset(x, offset, ks, padding, out_dtype=jnp.bfloat16)  # (b,K,HW)
    wmat = weight.reshape(outc, K).astype(jnp.bfloat16)                          # (OC,K)

    HWp, T_HW, Kp, T_K = _select_tiles(HW, K, outc, _VMEM_TILE_BUDGET,
                                       min_hw_tiles=2 if b == 1 else 1)

    # Padding only in rare fallback configurations (normally HWp == HW, Kp == K).
    if HWp != HW or Kp != K:
        x_off = jnp.pad(x_off, ((0, 0), (0, Kp - K), (0, HWp - HW)))
    if Kp != K:
        wmat = jnp.pad(wmat, ((0, 0), (0, Kp - K)))

    n_hw, n_k = HWp // T_HW, Kp // T_K

    needed = 2 * (T_HW * T_K * 2) + 2 * (T_K * outc * 2) + 2 * (outc * T_HW * 4)
    vmem_limit = int(min(48 * 2**20, max(32 * 2**20, 2 * needed + (4 << 20))))

    out = pl.pallas_call(
        _make_kernel(single_k_block=(n_k == 1)),
        out_shape=jax.ShapeDtypeStruct((b, outc, HWp), jnp.float32),
        grid_spec=pltpu.PrefetchScalarGridSpec(
            num_scalar_prefetch=0,
            grid=(b, n_hw, n_k),
            in_specs=[
                pl.BlockSpec((1, T_K, T_HW), lambda bi, hi, ki: (bi, ki, hi)),
                # weight block index is constant in the single-K-block regime ->
                # fetched exactly once for the whole grid (VMEM-resident).
                pl.BlockSpec((outc, T_K), lambda bi, hi, ki: (0, ki)),
            ],
            out_specs=pl.BlockSpec((1, outc, T_HW), lambda bi, hi, ki: (bi, 0, hi)),
        ),
        compiler_params=pltpu.CompilerParams(
            dimension_semantics=("parallel", "parallel", "arbitrary"),
            vmem_limit_bytes=vmem_limit),
    )(x_off, wmat)

    out = out[:, :, :HW].astype(out_dtype)        # no-op slice when HWp == HW
    return out.reshape(b, outc, h, w)             # already (B, C_out, H, W) layout


# ----------------------------------------------------------------------------
# Pure-JAX f32 reference (same sampling glue, dense einsum for the conv).
# ----------------------------------------------------------------------------
def deform_conv2d_ref(x, offset, weight, ks=3, padding=1):
    b, c, h, w = x.shape
    N = ks * ks
    outc = weight.shape[0]
    x_off = _bilinear_x_offset(x, offset, ks, padding)                 # (b, C*N, HW) f32
    out = jnp.einsum("bkp,ok->bop", x_off, weight.reshape(outc, c * N))
    return out.reshape(b, outc, h, w)


if __name__ == "__main__":
    ks, padding = 3, 1
    B, C_in, C_out, H, W = 2, 4, 8, 16, 16
    N = ks * ks

    key = jax.random.PRNGKey(0)
    kx, ko, kw = jax.random.split(key, 3)
    x = jax.random.normal(kx, (B, C_in, H, W), dtype=jnp.float32)
    offset = 2.0 * jax.random.normal(ko, (B, 2 * N, H, W), dtype=jnp.float32)
    weight = 0.1 * jax.random.normal(kw, (C_out, C_in, ks, ks), dtype=jnp.float32)

    fwd = jax.jit(deform_conv2d, static_argnames=("ks", "padding"))
    out = jax.block_until_ready(fwd(x, offset, weight, ks=ks, padding=padding))

    ref = deform_conv2d_ref(x, offset, weight, ks=ks, padding=padding)
    assert out.shape == (B, C_out, H, W)
    # bf16 matmul operands vs f32 reference -> loose (but meaningful) tolerance.
    assert jnp.allclose(out, ref, rtol=3e-2, atol=3e-2), "Pallas output mismatch vs reference"

    print("KERNEL_OK")
</pallas_src>

<mosaic_0001>
module attributes {stable_mosaic.version = 11 : i64} {
  func.func @kernel(%arg0: i32, %arg1: i32, %arg2: i32, %arg3: memref<1x36x256xbf16, #tpu.memory_space<vmem>>, %arg4: memref<8x36xbf16, #tpu.memory_space<vmem>>, %arg5: memref<1x8x256xf32, #tpu.memory_space<vmem>>) attributes {dimension_semantics = [#tpu.dimension_semantics<parallel>, #tpu.dimension_semantics<parallel>, #tpu.dimension_semantics<arbitrary>], iteration_bounds = array<i64: 2, 1, 1>, scalar_prefetch = 0 : i64, scratch_operands = 0 : i64, tpu.core_type = #tpu.core_type<tc>, window_params = [{transform_indices = @transform_0, window_bounds = array<i64: 1, 36, 256>}, {transform_indices = @transform_1, window_bounds = array<i64: 8, 36>}, {transform_indices = @transform_2, window_bounds = array<i64: 1, 8, 256>}]} {
    %c0 = arith.constant 0 : index
    %c0_0 = arith.constant 0 : index
    %0 = vector.load %arg4[%c0, %c0_0] : memref<8x36xbf16, #tpu.memory_space<vmem>>, vector<8x36xbf16>
    %c0_1 = arith.constant 0 : index
    %c0_2 = arith.constant 0 : index
    %c0_3 = arith.constant 0 : index
    %1 = vector.load %arg3[%c0_1, %c0_2, %c0_3] : memref<1x36x256xbf16, #tpu.memory_space<vmem>>, vector<1x36x256xbf16>
    %2 = vector.shape_cast %1 : vector<1x36x256xbf16> to vector<36x256xbf16>
    %cst = arith.constant dense<0.000000e+00> : vector<8x256xf32>
    %3 = tpu.matmul %0, %2, %cst {dimension_numbers = #tpu.dot_dimension_numbers<[1], [0], [0], [1], [0, 0, 1, 1], [], []>} : vector<8x36xbf16>, vector<36x256xbf16>, vector<8x256xf32> -> vector<8x256xf32>
    %c0_4 = arith.constant 0 : index
    %c0_5 = arith.constant 0 : index
    %c0_6 = arith.constant 0 : index
    %4 = vector.load %arg5[%c0_4, %c0_5, %c0_6] : memref<1x8x256xf32, #tpu.memory_space<vmem>>, vector<1x8x256xf32>
    %5 = vector.shape_cast %4 : vector<1x8x256xf32> to vector<8x256xf32>
    %6 = vector.shape_cast %3 : vector<8x256xf32> to vector<1x8x256xf32>
    tpu.vector_store %arg5[%c0_4, %c0_5, %c0_6], %6 {strides = array<i32>} : memref<1x8x256xf32, #tpu.memory_space<vmem>>, vector<1x8x256xf32>,
    return
  }
  func.func @transform_0(%arg0: i32, %arg1: i32, %arg2: i32) -> (i32, i32, i32) {
    %c0_i32 = arith.constant 0 : i32
    return %arg0, %arg2, %arg1 : i32, i32, i32
  }
  func.func @transform_1(%arg0: i32, %arg1: i32, %arg2: i32) -> (i32, i32) {
    %c0_i32 = arith.constant 0 : i32
    %c0_i32_0 = arith.constant 0 : i32
    return %c0_i32, %arg2 : i32, i32
  }
  func.func @transform_2(%arg0: i32, %arg1: i32, %arg2: i32) -> (i32, i32, i32) {
    %c0_i32 = arith.constant 0 : i32
    %c0_i32_0 = arith.constant 0 : i32
    return %arg0, %c0_i32, %arg1 : i32, i32, i32
  }
}

</mosaic_0001>

<bundles_post_ra>
// kernel: deform_conv2d.1
= control target key start
LH: loop header
LB: loop body
LE: loop exit
PB: predicated region body
PF: predicated region fallthrough
CT: control target
= control target key end

     0   :  { %s517_s9 = smov 0   ;;  %s519_s10 = smov 0   ;;  %s553_s0 = inlined_call_operand.vmem [shape: bf16[2,36,256], index: 0, kind: input, shape index: {}]   ;;  %s554_s1 = inlined_call_operand.vmem [shape: bf16[8,36], index: 1, kind: input, shape index: {}]   ;;  %s555_s2 = inlined_call_operand.vmem [shape: f32[2,8,256], index: 2, kind: output, shape index: {}]  }
   0x1   :  { %s521_s11 = smov 0  }
   0x2 LB: > { %s31_s12 = sadd.s32 1, %s495_s10  ;;  %p428_p0 = scmp.ge.s32.totalorder %s499_s11, 1  ;;  %s499_s11 = sphi %s521_s11, %s12_s11   ;;  %s495_s10 = sphi %s519_s10, %s557_s10   ;;  %s491_s9 = sphi %s517_s9, %s556_s9  }
   0x3   : > { %p33_p1 = scmp.ge.s32.totalorder %s31_s12, 2  ;;  %p157_p2 = scmp.lt.s32.totalorder %s499_s11, 3 }
   0x5   : > { %s559_s12 = smov (%p33_p1, %s31_s12), 0  ;;  %p158_p3 = pnand %p428_p0, %p157_p2 }
   0x6   : > { %p198_p4 = scmp.lt.s32.totalorder (!%p158_p3), %s491_s9, 1 }
   0x7   : > { %161 = sbr.rel (%p158_p3) target bundleno = 230 (0xe6), region = 28 }
   0xc   : > { %v501_v0 = vmov 0   ;;  %s561_s9 = smov (!%p198_p4, %s491_s9), 1  ;;  %vm262_vm0 = vcmask 1041408   ;;  %v227_v9 = vld [vmem:[%s554_s1] sm:$0xf]  ;;  %vm258_vm1 = vcmask 293888  }
   0xd   : > { %301 = vmatprep.mubr.bf16.mxu0 %v501_v0  ;;  %s443_s13 = smul.u32 40, %s561_s9  ;;  %s442_s19 = sshll.u32 %s561_s9, 4 }
   0xe   : > { %s224_s22 = scalar_lea.vmem %s555_s2, %s442_s19 }
   0xf   : > { %s209_s16 = scalar_lea.vmem %s553_s0, %s443_s13 }
  0x10   : > { %v232_v1 = vld [vmem:[%s209_s16 + $0x20] sm:$0x33]  ;;  %v471_v4 = vld [vmem:[%s209_s16 + $0x14] ss:$8 sps:$4 sm:$0xff]   ;;  %v473_v6 = vld [vmem:[%s209_s16 + $0x10] ss:$8 sps:$4 sm:$0xff]  }
  0x11   : > { %v437_v2 = vcombine.high %v232_v1, %v232_v1  ;;  %v436_v3 = vcombine.low %v232_v1, %v232_v1  ;;  %v474_v7 = vld [vmem:[%s209_s16 + $0x4] ss:$8 sps:$4 sm:$0xff]   ;;  %v476_v8 = vld [vmem:[%s209_s16] ss:$8 sps:$4 sm:$0xff]  }
  0x13   : > { %438 = vmatprep.subr.msk.bf16.mxu0 %vm262_vm0, %v437_v2  ;;  %v264_v5 = vsel %vm262_vm0, %v436_v3, 0 }
  0x14   : > { %280 = vmatpush1.bf16.msra.mxu0 %v264_v5 }
  0x15   : > { %281 = vmatprep.subr.bf16.mxu0 %v471_v4 }
  0x18   : > { %282 = vmatpush1.bf16.msra.mxu0 %v473_v6 }
  0x19   : > { %283 = vmatprep.subr.bf16.mxu0 %v474_v7 }
  0x1c   : > { %284 = vmatpush1.bf16.msra.mxu0 %v476_v8 }
  0x1f   : > { %439 = vmatmul.mubr.msk.bf16.vlgmr.msra.gmra.mxu0 %vm258_vm1, %v227_v9 }
  0xdf   : > { %v303_v10 = vpop.f32.mrf.mxu0 }
  0xe0   : > { %310 = vst [vmem:[%s224_s22] sm:$0xff] %v303_v10 }
  0xe1   : > { %v305_v11 = vpop.f32.mrf.mxu0 }
  0xe2   : > { %311 = vst [vmem:[%s224_s22 + $0x8] sm:$0xff] %v305_v11 }
  0xe3   : > { %v307_v12 = vpop.f32.mrf.mxu0 }
  0xe5   : > { %v308_v13 = vpop.f32.mrf.mxu0 }
  0xe6 PF: > { %s12_s11 = sadd.s32 1, %s499_s11   ;;  %s556_s9 = smov %s495_s10 }
  0xe7   : > { %p9_p5 = scmp.ge.s32.totalorder %s12_s11, 4   ;;  %s557_s10 = smov %s559_s12 }
  0xe9   :  { %11 = sbr.rel (!%p9_p5) target bundleno = 2 (0x2), region = 61 }

</bundles_post_ra>
